<compile_context>
chip_gen: v7x
topology: tpu7x:2x2x1
jax: 0.10.0
libtpu: 0.0.40
codegen_flags: <defaults>
</compile_context>

<pallas_src>
import functools

import jax
import jax.numpy as jnp
from jax import lax
from jax.experimental import pallas as pl
from jax.experimental.pallas import tpu as pltpu


def _round_up(x, m):
    return ((x + m - 1) // m) * m


def _fasttext_kernel(ids_ref, emb_hbm, wt_ref, b_ref, out_ref, gather_ref, sem, *,
                     seq_len, n_chunks):
    # ids_ref    : SMEM (TB, S_pad) int32  -- per-tile token ids (pad positions -> zero row id)
    # emb_hbm    : HBM  (V_pad, D_pad) f32 -- embedding table, rows gathered by manual DMA
    # wt_ref     : VMEM (D_pad, C_pad) f32 -- W^T, zero padded
    # b_ref      : VMEM (1, C_pad) f32     -- bias, padded lanes = -1e30
    # out_ref    : VMEM (TB, C_pad) f32
    # gather_ref : VMEM (2, CHUNK, TB, D_pad) f32 -- double-buffered gather staging
    # sem        : DMA semaphores, shape (2,) -- one per buffer slot
    _, chunk, tb, d_pad = gather_ref.shape

    def issue_chunk(c, slot):
        base = c * chunk

        def per_token(t, carry):
            col = base + t

            def per_row(r, c2):
                tok = ids_ref[r, col]
                pltpu.make_async_copy(
                    emb_hbm.at[pl.ds(tok, 1), :],            # (1, D_pad) row in HBM
                    gather_ref.at[slot, t, pl.ds(r, 1), :],  # (1, D_pad) row in VMEM
                    sem.at[slot],
                ).start()
                return c2

            lax.fori_loop(0, tb, per_row, 0, unroll=True)
            return carry

        lax.fori_loop(0, chunk, per_token, 0)

    # Prime the pipeline with chunk 0 into slot 0.
    issue_chunk(0, 0)

    def chunk_body(c, acc):
        slot = c % 2

        # Prefetch the next chunk into the other slot so its DMAs overlap this chunk's
        # wait + accumulate.
        @pl.when(c + 1 < n_chunks)
        def _():
            issue_chunk(c + 1, 1 - slot)

        # Single wait per chunk, sized to the chunk's total bytes (== sum of the CHUNK*TB
        # (1, D_pad) row copies issued against sem[slot]).
        pltpu.make_async_copy(
            gather_ref.at[1 - slot], gather_ref.at[slot], sem.at[slot]
        ).wait()

        return acc + jnp.sum(gather_ref[slot], axis=0)      # (TB, D_pad)

    acc = lax.fori_loop(0, n_chunks, chunk_body,
                        jnp.zeros((tb, d_pad), jnp.float32))

    # Mean over the TRUE sequence length (padded positions contributed zero rows).
    mean = acc * jnp.float32(1.0 / seq_len)

    # Linear + softmax (lane-dense C_pad output; padded class lanes vanish via -1e30 bias).
    logits = jnp.dot(mean, wt_ref[...],
                     preferred_element_type=jnp.float32) + b_ref[...]   # (TB, C_pad)
    m = jnp.max(logits, axis=-1, keepdims=True)
    e = jnp.exp(logits - m)
    denom = jnp.sum(e, axis=-1, keepdims=True)
    out_ref[...] = e * pl.reciprocal(denom, approx=True)


def fasttext_forward(ids, emb_table, W, b, *, batch_tile=32, chunk_tokens=16):
    """Pallas-TPU equivalent of FastText.forward.

    ids:       (B, S) int token ids
    emb_table: (V, D) f32 embedding table (row 0 = padding embedding)
    W:         (C, D) f32 (PyTorch nn.Linear weight layout)
    b:         (C,)   f32
    returns    (B, C) f32 class probabilities (softmax).
    """
    B, S = ids.shape
    V, D = emb_table.shape
    C = W.shape[0]

    # ---- Tile sizing (keep TB a multiple of 8; clamp for tiny batches). ----
    TB = max(8, min(_round_up(batch_tile, 8), _round_up(B, 8)))
    B_pad = _round_up(B, TB)
    n_tiles = B_pad // TB            # NOTE: on v7x keep n_tiles >= 2 so both TCs are fed.
    CHUNK = max(1, min(chunk_tokens, S))
    S_pad = _round_up(S, CHUNK)
    n_chunks = S_pad // CHUNK

    # ---- Lane/sublane-aligned padding. ----
    D_pad = _round_up(D, 128)        # lane-aligned rows -> every gather DMA is 128-lane dense
    C_pad = _round_up(C, 128)        # lane-dense logits / output store
    V_pad = _round_up(V + 1, 8)      # at least one guaranteed-zero row; used as padding token
    pad_tok = V                      # row V (and beyond) is all zeros in the padded table

    emb_p = jnp.zeros((V_pad, D_pad), jnp.float32).at[:V, :D].set(
        emb_table.astype(jnp.float32))
    Wt = jnp.zeros((D_pad, C_pad), jnp.float32).at[:D, :C].set(
        W.astype(jnp.float32).T)
    b_p = jnp.full((1, C_pad), -1e30, jnp.float32).at[0, :C].set(
        b.astype(jnp.float32))

    # Clamp real ids (no runtime bounds checks in Pallas); pad batch/sequence with the zero-row id.
    ids = jnp.clip(ids.astype(jnp.int32), 0, V - 1)
    ids_p = jnp.full((B_pad, S_pad), pad_tok, jnp.int32).at[:B, :S].set(ids)

    kernel = functools.partial(_fasttext_kernel, seq_len=S, n_chunks=n_chunks)

    # Explicit VMEM budget: gather scratch + double-buffered W^T / bias / output blocks + slack.
    vmem_bytes = 4 * (2 * CHUNK * TB * D_pad
                      + 2 * D_pad * C_pad
                      + 2 * TB * C_pad
                      + 16 * C_pad + TB * D_pad)
    vmem_limit = int(min(48 * 2**20, max(16 * 2**20, 2 * vmem_bytes)))

    out_padded = pl.pallas_call(
        kernel,
        out_shape=jax.ShapeDtypeStruct((B_pad, C_pad), jnp.float32),
        grid_spec=pltpu.PrefetchScalarGridSpec(
            num_scalar_prefetch=0,
            grid=(n_tiles,),
            in_specs=[
                pl.BlockSpec((TB, S_pad), lambda i: (i, 0),
                             memory_space=pltpu.MemorySpace.SMEM),   # per-tile ids in SMEM
                pl.BlockSpec(memory_space=pl.ANY),                   # emb table stays in HBM
                pl.BlockSpec((D_pad, C_pad), lambda i: (0, 0)),      # resident W^T
                pl.BlockSpec((1, C_pad), lambda i: (0, 0)),          # resident bias
            ],
            out_specs=pl.BlockSpec((TB, C_pad), lambda i: (i, 0)),
            scratch_shapes=[
                pltpu.VMEM((2, CHUNK, TB, D_pad), jnp.float32),      # gather double buffer
                pltpu.SemaphoreType.DMA((2,)),                       # one DMA sem per slot
            ],
        ),
        compiler_params=pltpu.CompilerParams(
            dimension_semantics=("parallel",),                       # batch tiles independent
            vmem_limit_bytes=vmem_limit,
        ),
    )(ids_p, emb_p, Wt, b_p)

    return out_padded[:B, :C]


def fasttext_reference(ids, emb_table, W, b):
    emb = emb_table[ids]                     # (B, S, D)
    mean = emb.mean(axis=1)                  # (B, D)
    logits = mean @ W.T + b                  # (B, C)
    return jax.nn.softmax(logits, axis=-1)


if __name__ == "__main__":
    vocab_size, emb_dim, num_classes = 64, 32, 4
    batch, seq = 2, 8

    key = jax.random.PRNGKey(0)
    k_emb, k_w, k_b, k_ids = jax.random.split(key, 4)

    # nn.Embedding(vocab_size, emb_dim, padding_idx=0): N(0,1) init, row 0 zeroed.
    emb_table = jax.random.normal(k_emb, (vocab_size, emb_dim), dtype=jnp.float32)
    emb_table = emb_table.at[0].set(0.0)

    # nn.Linear(emb_dim, num_classes): deterministic small init (not loading a checkpoint).
    W = jax.random.normal(k_w, (num_classes, emb_dim), dtype=jnp.float32) * 0.1
    b = jax.random.normal(k_b, (num_classes,), dtype=jnp.float32) * 0.1

    ids = jax.random.randint(k_ids, (batch, seq), 0, vocab_size, dtype=jnp.int32)

    out = fasttext_forward(ids, emb_table, W, b)
    out = jax.block_until_ready(out)

    ref = fasttext_reference(ids, emb_table, W, b)
    assert out.shape == (batch, num_classes)
    # Tolerance allows for the approx (EUP) reciprocal in the in-kernel softmax.
    assert jnp.allclose(out, ref, atol=2e-3, rtol=2e-3), (out, ref)

    print("KERNEL_OK")
</pallas_src>

<mosaic_0001>
module attributes {stable_mosaic.version = 11 : i64} {
  func.func @_fasttext_kernel(%arg0: i32, %arg1: memref<8x8xi32, #tpu.memory_space<smem>>, %arg2: memref<72x128xf32, #tpu.memory_space<any>>, %arg3: memref<128x128xf32, #tpu.memory_space<vmem>>, %arg4: memref<1x128xf32, #tpu.memory_space<vmem>>, %arg5: memref<8x128xf32, #tpu.memory_space<vmem>>, %arg6: memref<2x8x8x128xf32, #tpu.memory_space<vmem>>, %arg7: memref<2x!tpu.dma_semaphore, #tpu.memory_space<semaphore_mem>>) attributes {dimension_semantics = [#tpu.dimension_semantics<parallel>], iteration_bounds = array<i64: 1>, scalar_prefetch = 0 : i64, scratch_operands = 2 : i64, tpu.core_type = #tpu.core_type<tc>, window_params = [{transform_indices = @transform_0, window_bounds = array<i64: 8, 8>}, {}, {pipeline_mode = #tpu.pipeline_mode<synchronous>, transform_indices = @transform_2, window_bounds = array<i64: 128, 128>}, {pipeline_mode = #tpu.pipeline_mode<synchronous>, transform_indices = @transform_3, window_bounds = array<i64: 1, 128>}, {transform_indices = @transform_4, window_bounds = array<i64: 8, 128>}]} {
    %c0_i32 = arith.constant 0 : i32
    %c8_i32 = arith.constant 8 : i32
    %0 = arith.addi %c0_i32, %c8_i32 : i32
    %c1_i32 = arith.constant 1 : i32
    scf.for %arg8 = %c0_i32 to %0 step %c1_i32  : i32 {
      %c0_i32_31 = arith.constant 0 : i32
      %46 = arith.addi %c0_i32_31, %arg8 : i32
      %c0_i32_32 = arith.constant 0 : i32
      %47 = arith.index_cast %c0_i32_32 : i32 to index
      %48 = arith.index_cast %46 : i32 to index
      %49 = memref.load %arg1[%47, %48] : memref<8x8xi32, #tpu.memory_space<smem>>
      %c0_i32_33 = arith.constant 0 : i32
      %c0_i32_34 = arith.constant 0 : i32
      %c0_i32_35 = arith.constant 0 : i32
      %50 = tpu.memref_slice %arg2[%49, %c0_i32_35] : memref<72x128xf32, #tpu.memory_space<any>> -> memref<1x128xf32, #tpu.memory_space<any>>
      %c0_i32_36 = arith.constant 0 : i32
      %51 = tpu.memref_slice %arg6[%c0_i32_33, %arg8, %c0_i32_32, %c0_i32_36] : memref<2x8x8x128xf32, #tpu.memory_space<vmem>> -> memref<1x1x1x128xf32, #tpu.memory_space<vmem>>
      %52 = tpu.memref_squeeze %51 : memref<1x1x1x128xf32, #tpu.memory_space<vmem>> -> memref<1x128xf32, #tpu.memory_space<vmem>>
      %53 = tpu.memref_slice %arg7[%c0_i32_34] : memref<2x!tpu.dma_semaphore, #tpu.memory_space<semaphore_mem>> -> memref<1x!tpu.dma_semaphore, #tpu.memory_space<semaphore_mem>>
      %54 = tpu.memref_squeeze %53 : memref<1x!tpu.dma_semaphore, #tpu.memory_space<semaphore_mem>> -> memref<!tpu.dma_semaphore, #tpu.memory_space<semaphore_mem>>
      tpu.enqueue_dma source(%50 : memref<1x128xf32, #tpu.memory_space<any>>) target(%52 : memref<1x128xf32, #tpu.memory_space<vmem>>) target_semaphore(%54 : memref<!tpu.dma_semaphore, #tpu.memory_space<semaphore_mem>>)
      %c1_i32_37 = arith.constant 1 : i32
      %55 = arith.index_cast %c1_i32_37 : i32 to index
      %56 = arith.index_cast %46 : i32 to index
      %57 = memref.load %arg1[%55, %56] : memref<8x8xi32, #tpu.memory_space<smem>>
      %c0_i32_38 = arith.constant 0 : i32
      %c0_i32_39 = arith.constant 0 : i32
      %c0_i32_40 = arith.constant 0 : i32
      %58 = tpu.memref_slice %arg2[%57, %c0_i32_40] : memref<72x128xf32, #tpu.memory_space<any>> -> memref<1x128xf32, #tpu.memory_space<any>>
      %c0_i32_41 = arith.constant 0 : i32
      %59 = tpu.memref_slice %arg6[%c0_i32_38, %arg8, %c1_i32_37, %c0_i32_41] : memref<2x8x8x128xf32, #tpu.memory_space<vmem>> -> memref<1x1x1x128xf32, #tpu.memory_space<vmem>>
      %60 = tpu.memref_squeeze %59 : memref<1x1x1x128xf32, #tpu.memory_space<vmem>> -> memref<1x128xf32, #tpu.memory_space<vmem>>
      %61 = tpu.memref_slice %arg7[%c0_i32_39] : memref<2x!tpu.dma_semaphore, #tpu.memory_space<semaphore_mem>> -> memref<1x!tpu.dma_semaphore, #tpu.memory_space<semaphore_mem>>
      %62 = tpu.memref_squeeze %61 : memref<1x!tpu.dma_semaphore, #tpu.memory_space<semaphore_mem>> -> memref<!tpu.dma_semaphore, #tpu.memory_space<semaphore_mem>>
      tpu.enqueue_dma source(%58 : memref<1x128xf32, #tpu.memory_space<any>>) target(%60 : memref<1x128xf32, #tpu.memory_space<vmem>>) target_semaphore(%62 : memref<!tpu.dma_semaphore, #tpu.memory_space<semaphore_mem>>)
      %c2_i32_42 = arith.constant 2 : i32
      %63 = arith.index_cast %c2_i32_42 : i32 to index
      %64 = arith.index_cast %46 : i32 to index
      %65 = memref.load %arg1[%63, %64] : memref<8x8xi32, #tpu.memory_space<smem>>
      %c0_i32_43 = arith.constant 0 : i32
      %c0_i32_44 = arith.constant 0 : i32
      %c0_i32_45 = arith.constant 0 : i32
      %66 = tpu.memref_slice %arg2[%65, %c0_i32_45] : memref<72x128xf32, #tpu.memory_space<any>> -> memref<1x128xf32, #tpu.memory_space<any>>
      %c0_i32_46 = arith.constant 0 : i32
      %67 = tpu.memref_slice %arg6[%c0_i32_43, %arg8, %c2_i32_42, %c0_i32_46] : memref<2x8x8x128xf32, #tpu.memory_space<vmem>> -> memref<1x1x1x128xf32, #tpu.memory_space<vmem>>
      %68 = tpu.memref_squeeze %67 : memref<1x1x1x128xf32, #tpu.memory_space<vmem>> -> memref<1x128xf32, #tpu.memory_space<vmem>>
      %69 = tpu.memref_slice %arg7[%c0_i32_44] : memref<2x!tpu.dma_semaphore, #tpu.memory_space<semaphore_mem>> -> memref<1x!tpu.dma_semaphore, #tpu.memory_space<semaphore_mem>>
      %70 = tpu.memref_squeeze %69 : memref<1x!tpu.dma_semaphore, #tpu.memory_space<semaphore_mem>> -> memref<!tpu.dma_semaphore, #tpu.memory_space<semaphore_mem>>
      tpu.enqueue_dma source(%66 : memref<1x128xf32, #tpu.memory_space<any>>) target(%68 : memref<1x128xf32, #tpu.memory_space<vmem>>) target_semaphore(%70 : memref<!tpu.dma_semaphore, #tpu.memory_space<semaphore_mem>>)
      %c3_i32 = arith.constant 3 : i32
      %71 = arith.index_cast %c3_i32 : i32 to index
      %72 = arith.index_cast %46 : i32 to index
      %73 = memref.load %arg1[%71, %72] : memref<8x8xi32, #tpu.memory_space<smem>>
      %c0_i32_47 = arith.constant 0 : i32
      %c0_i32_48 = arith.constant 0 : i32
      %c0_i32_49 = arith.constant 0 : i32
      %74 = tpu.memref_slice %arg2[%73, %c0_i32_49] : memref<72x128xf32, #tpu.memory_space<any>> -> memref<1x128xf32, #tpu.memory_space<any>>
      %c0_i32_50 = arith.constant 0 : i32
      %75 = tpu.memref_slice %arg6[%c0_i32_47, %arg8, %c3_i32, %c0_i32_50] : memref<2x8x8x128xf32, #tpu.memory_space<vmem>> -> memref<1x1x1x128xf32, #tpu.memory_space<vmem>>
      %76 = tpu.memref_squeeze %75 : memref<1x1x1x128xf32, #tpu.memory_space<vmem>> -> memref<1x128xf32, #tpu.memory_space<vmem>>
      %77 = tpu.memref_slice %arg7[%c0_i32_48] : memref<2x!tpu.dma_semaphore, #tpu.memory_space<semaphore_mem>> -> memref<1x!tpu.dma_semaphore, #tpu.memory_space<semaphore_mem>>
      %78 = tpu.memref_squeeze %77 : memref<1x!tpu.dma_semaphore, #tpu.memory_space<semaphore_mem>> -> memref<!tpu.dma_semaphore, #tpu.memory_space<semaphore_mem>>
      tpu.enqueue_dma source(%74 : memref<1x128xf32, #tpu.memory_space<any>>) target(%76 : memref<1x128xf32, #tpu.memory_space<vmem>>) target_semaphore(%78 : memref<!tpu.dma_semaphore, #tpu.memory_space<semaphore_mem>>)
      %c4_i32 = arith.constant 4 : i32
      %79 = arith.index_cast %c4_i32 : i32 to index
      %80 = arith.index_cast %46 : i32 to index
      %81 = memref.load %arg1[%79, %80] : memref<8x8xi32, #tpu.memory_space<smem>>
      %c0_i32_51 = arith.constant 0 : i32
      %c0_i32_52 = arith.constant 0 : i32
      %c0_i32_53 = arith.constant 0 : i32
      %82 = tpu.memref_slice %arg2[%81, %c0_i32_53] : memref<72x128xf32, #tpu.memory_space<any>> -> memref<1x128xf32, #tpu.memory_space<any>>
      %c0_i32_54 = arith.constant 0 : i32
      %83 = tpu.memref_slice %arg6[%c0_i32_51, %arg8, %c4_i32, %c0_i32_54] : memref<2x8x8x128xf32, #tpu.memory_space<vmem>> -> memref<1x1x1x128xf32, #tpu.memory_space<vmem>>
      %84 = tpu.memref_squeeze %83 : memref<1x1x1x128xf32, #tpu.memory_space<vmem>> -> memref<1x128xf32, #tpu.memory_space<vmem>>
      %85 = tpu.memref_slice %arg7[%c0_i32_52] : memref<2x!tpu.dma_semaphore, #tpu.memory_space<semaphore_mem>> -> memref<1x!tpu.dma_semaphore, #tpu.memory_space<semaphore_mem>>
      %86 = tpu.memref_squeeze %85 : memref<1x!tpu.dma_semaphore, #tpu.memory_space<semaphore_mem>> -> memref<!tpu.dma_semaphore, #tpu.memory_space<semaphore_mem>>
      tpu.enqueue_dma source(%82 : memref<1x128xf32, #tpu.memory_space<any>>) target(%84 : memref<1x128xf32, #tpu.memory_space<vmem>>) target_semaphore(%86 : memref<!tpu.dma_semaphore, #tpu.memory_space<semaphore_mem>>)
      %c5_i32 = arith.constant 5 : i32
      %87 = arith.index_cast %c5_i32 : i32 to index
      %88 = arith.index_cast %46 : i32 to index
      %89 = memref.load %arg1[%87, %88] : memref<8x8xi32, #tpu.memory_space<smem>>
      %c0_i32_55 = arith.constant 0 : i32
      %c0_i32_56 = arith.constant 0 : i32
      %c0_i32_57 = arith.constant 0 : i32
      %90 = tpu.memref_slice %arg2[%89, %c0_i32_57] : memref<72x128xf32, #tpu.memory_space<any>> -> memref<1x128xf32, #tpu.memory_space<any>>
      %c0_i32_58 = arith.constant 0 : i32
      %91 = tpu.memref_slice %arg6[%c0_i32_55, %arg8, %c5_i32, %c0_i32_58] : memref<2x8x8x128xf32, #tpu.memory_space<vmem>> -> memref<1x1x1x128xf32, #tpu.memory_space<vmem>>
      %92 = tpu.memref_squeeze %91 : memref<1x1x1x128xf32, #tpu.memory_space<vmem>> -> memref<1x128xf32, #tpu.memory_space<vmem>>
      %93 = tpu.memref_slice %arg7[%c0_i32_56] : memref<2x!tpu.dma_semaphore, #tpu.memory_space<semaphore_mem>> -> memref<1x!tpu.dma_semaphore, #tpu.memory_space<semaphore_mem>>
      %94 = tpu.memref_squeeze %93 : memref<1x!tpu.dma_semaphore, #tpu.memory_space<semaphore_mem>> -> memref<!tpu.dma_semaphore, #tpu.memory_space<semaphore_mem>>
      tpu.enqueue_dma source(%90 : memref<1x128xf32, #tpu.memory_space<any>>) target(%92 : memref<1x128xf32, #tpu.memory_space<vmem>>) target_semaphore(%94 : memref<!tpu.dma_semaphore, #tpu.memory_space<semaphore_mem>>)
      %c6_i32 = arith.constant 6 : i32
      %95 = arith.index_cast %c6_i32 : i32 to index
      %96 = arith.index_cast %46 : i32 to index
      %97 = memref.load %arg1[%95, %96] : memref<8x8xi32, #tpu.memory_space<smem>>
      %c0_i32_59 = arith.constant 0 : i32
      %c0_i32_60 = arith.constant 0 : i32
      %c0_i32_61 = arith.constant 0 : i32
      %98 = tpu.memref_slice %arg2[%97, %c0_i32_61] : memref<72x128xf32, #tpu.memory_space<any>> -> memref<1x128xf32, #tpu.memory_space<any>>
      %c0_i32_62 = arith.constant 0 : i32
      %99 = tpu.memref_slice %arg6[%c0_i32_59, %arg8, %c6_i32, %c0_i32_62] : memref<2x8x8x128xf32, #tpu.memory_space<vmem>> -> memref<1x1x1x128xf32, #tpu.memory_space<vmem>>
      %100 = tpu.memref_squeeze %99 : memref<1x1x1x128xf32, #tpu.memory_space<vmem>> -> memref<1x128xf32, #tpu.memory_space<vmem>>
      %101 = tpu.memref_slice %arg7[%c0_i32_60] : memref<2x!tpu.dma_semaphore, #tpu.memory_space<semaphore_mem>> -> memref<1x!tpu.dma_semaphore, #tpu.memory_space<semaphore_mem>>
      %102 = tpu.memref_squeeze %101 : memref<1x!tpu.dma_semaphore, #tpu.memory_space<semaphore_mem>> -> memref<!tpu.dma_semaphore, #tpu.memory_space<semaphore_mem>>
      tpu.enqueue_dma source(%98 : memref<1x128xf32, #tpu.memory_space<any>>) target(%100 : memref<1x128xf32, #tpu.memory_space<vmem>>) target_semaphore(%102 : memref<!tpu.dma_semaphore, #tpu.memory_space<semaphore_mem>>)
      %c7_i32 = arith.constant 7 : i32
      %103 = arith.index_cast %c7_i32 : i32 to index
      %104 = arith.index_cast %46 : i32 to index
      %105 = memref.load %arg1[%103, %104] : memref<8x8xi32, #tpu.memory_space<smem>>
      %c0_i32_63 = arith.constant 0 : i32
      %c0_i32_64 = arith.constant 0 : i32
      %c0_i32_65 = arith.constant 0 : i32
      %106 = tpu.memref_slice %arg2[%105, %c0_i32_65] : memref<72x128xf32, #tpu.memory_space<any>> -> memref<1x128xf32, #tpu.memory_space<any>>
      %c0_i32_66 = arith.constant 0 : i32
      %107 = tpu.memref_slice %arg6[%c0_i32_63, %arg8, %c7_i32, %c0_i32_66] : memref<2x8x8x128xf32, #tpu.memory_space<vmem>> -> memref<1x1x1x128xf32, #tpu.memory_space<vmem>>
      %108 = tpu.memref_squeeze %107 : memref<1x1x1x128xf32, #tpu.memory_space<vmem>> -> memref<1x128xf32, #tpu.memory_space<vmem>>
      %109 = tpu.memref_slice %arg7[%c0_i32_64] : memref<2x!tpu.dma_semaphore, #tpu.memory_space<semaphore_mem>> -> memref<1x!tpu.dma_semaphore, #tpu.memory_space<semaphore_mem>>
      %110 = tpu.memref_squeeze %109 : memref<1x!tpu.dma_semaphore, #tpu.memory_space<semaphore_mem>> -> memref<!tpu.dma_semaphore, #tpu.memory_space<semaphore_mem>>
      tpu.enqueue_dma source(%106 : memref<1x128xf32, #tpu.memory_space<any>>) target(%108 : memref<1x128xf32, #tpu.memory_space<vmem>>) target_semaphore(%110 : memref<!tpu.dma_semaphore, #tpu.memory_space<semaphore_mem>>)
      %c8_i32_67 = arith.constant 8 : i32
    }
    %c8_i32_0 = arith.constant 8 : i32
    %cst = arith.constant 0.000000e+00 : f32
    %1 = vector.broadcast %cst : f32 to vector<8x128xf32>
    %c0_i32_1 = arith.constant 0 : i32
    %c2_i32 = arith.constant 2 : i32
    %c0_i32_2 = arith.constant 0 : i32
    %2 = arith.cmpi eq, %c2_i32, %c0_i32_2 : i32
    %c1_i32_3 = arith.constant 1 : i32
    %3 = arith.select %2, %c1_i32_3, %c2_i32 : i32
    %4 = arith.remsi %c0_i32_1, %3 : i32
    %c0_i32_4 = arith.constant 0 : i32
    %5 = arith.cmpi ne, %4, %c0_i32_4 : i32
    %c0_i32_5 = arith.constant 0 : i32
    %6 = arith.cmpi slt, %4, %c0_i32_5 : i32
    %c0_i32_6 = arith.constant 0 : i32
    %7 = arith.cmpi slt, %3, %c0_i32_6 : i32
    %8 = arith.xori %6, %7 : i1
    %9 = arith.andi %8, %5 : i1
    %10 = arith.addi %4, %3 : i32
    %11 = arith.select %9, %10, %4 : i32
    %c1_i32_7 = arith.constant 1 : i32
    %12 = arith.addi %c0_i32_1, %c1_i32_7 : i32
    %c1_i32_8 = arith.constant 1 : i32
    %13 = arith.cmpi slt, %12, %c1_i32_8 : i32
    %14 = arith.extui %13 : i1 to i32
    %c0_i32_9 = arith.constant 0 : i32
    %15 = arith.cmpi ne, %14, %c0_i32_9 : i32
    scf.if %15 {
      %c1_i32_31 = arith.constant 1 : i32
      %46 = arith.addi %c0_i32_1, %c1_i32_31 : i32
      %c1_i32_32 = arith.constant 1 : i32
      %47 = arith.subi %c1_i32_32, %11 : i32
      %c8_i32_33 = arith.constant 8 : i32
      %48 = arith.muli %46, %c8_i32_33 : i32
      %c0_i32_34 = arith.constant 0 : i32
      %c8_i32_35 = arith.constant 8 : i32
      %49 = arith.addi %c0_i32_34, %c8_i32_35 : i32
      %c1_i32_36 = arith.constant 1 : i32
      scf.for %arg8 = %c0_i32_34 to %49 step %c1_i32_36  : i32 {
        %50 = arith.addi %48, %arg8 : i32
        %c0_i32_38 = arith.constant 0 : i32
        %51 = arith.index_cast %c0_i32_38 : i32 to index
        %52 = arith.index_cast %50 : i32 to index
        %53 = memref.load %arg1[%51, %52] : memref<8x8xi32, #tpu.memory_space<smem>>
        %c0_i32_39 = arith.constant 0 : i32
        %54 = tpu.memref_slice %arg2[%53, %c0_i32_39] : memref<72x128xf32, #tpu.memory_space<any>> -> memref<1x128xf32, #tpu.memory_space<any>>
        %c0_i32_40 = arith.constant 0 : i32
        %55 = tpu.memref_slice %arg6[%47, %arg8, %c0_i32_38, %c0_i32_40] : memref<2x8x8x128xf32, #tpu.memory_space<vmem>> -> memref<1x1x1x128xf32, #tpu.memory_space<vmem>>
        %56 = tpu.memref_squeeze %55 : memref<1x1x1x128xf32, #tpu.memory_space<vmem>> -> memref<1x128xf32, #tpu.memory_space<vmem>>
        %57 = tpu.memref_slice %arg7[%47] : memref<2x!tpu.dma_semaphore, #tpu.memory_space<semaphore_mem>> -> memref<1x!tpu.dma_semaphore, #tpu.memory_space<semaphore_mem>>
        %58 = tpu.memref_squeeze %57 : memref<1x!tpu.dma_semaphore, #tpu.memory_space<semaphore_mem>> -> memref<!tpu.dma_semaphore, #tpu.memory_space<semaphore_mem>>
        tpu.enqueue_dma source(%54 : memref<1x128xf32, #tpu.memory_space<any>>) target(%56 : memref<1x128xf32, #tpu.memory_space<vmem>>) target_semaphore(%58 : memref<!tpu.dma_semaphore, #tpu.memory_space<semaphore_mem>>)
        %c1_i32_41 = arith.constant 1 : i32
        %59 = arith.index_cast %c1_i32_41 : i32 to index
        %60 = arith.index_cast %50 : i32 to index
        %61 = memref.load %arg1[%59, %60] : memref<8x8xi32, #tpu.memory_space<smem>>
        %c0_i32_42 = arith.constant 0 : i32
        %62 = tpu.memref_slice %arg2[%61, %c0_i32_42] : memref<72x128xf32, #tpu.memory_space<any>> -> memref<1x128xf32, #tpu.memory_space<any>>
        %c0_i32_43 = arith.constant 0 : i32
        %63 = tpu.memref_slice %arg6[%47, %arg8, %c1_i32_41, %c0_i32_43] : memref<2x8x8x128xf32, #tpu.memory_space<vmem>> -> memref<1x1x1x128xf32, #tpu.memory_space<vmem>>
        %64 = tpu.memref_squeeze %63 : memref<1x1x1x128xf32, #tpu.memory_space<vmem>> -> memref<1x128xf32, #tpu.memory_space<vmem>>
        %65 = tpu.memref_slice %arg7[%47] : memref<2x!tpu.dma_semaphore, #tpu.memory_space<semaphore_mem>> -> memref<1x!tpu.dma_semaphore, #tpu.memory_space<semaphore_mem>>
        %66 = tpu.memref_squeeze %65 : memref<1x!tpu.dma_semaphore, #tpu.memory_space<semaphore_mem>> -> memref<!tpu.dma_semaphore, #tpu.memory_space<semaphore_mem>>
        tpu.enqueue_dma source(%62 : memref<1x128xf32, #tpu.memory_space<any>>) target(%64 : memref<1x128xf32, #tpu.memory_space<vmem>>) target_semaphore(%66 : memref<!tpu.dma_semaphore, #tpu.memory_space<semaphore_mem>>)
        %c2_i32_44 = arith.constant 2 : i32
        %67 = arith.index_cast %c2_i32_44 : i32 to index
        %68 = arith.index_cast %50 : i32 to index
        %69 = memref.load %arg1[%67, %68] : memref<8x8xi32, #tpu.memory_space<smem>>
        %c0_i32_45 = arith.constant 0 : i32
        %70 = tpu.memref_slice %arg2[%69, %c0_i32_45] : memref<72x128xf32, #tpu.memory_space<any>> -> memref<1x128xf32, #tpu.memory_space<any>>
        %c0_i32_46 = arith.constant 0 : i32
        %71 = tpu.memref_slice %arg6[%47, %arg8, %c2_i32_44, %c0_i32_46] : memref<2x8x8x128xf32, #tpu.memory_space<vmem>> -> memref<1x1x1x128xf32, #tpu.memory_space<vmem>>
        %72 = tpu.memref_squeeze %71 : memref<1x1x1x128xf32, #tpu.memory_space<vmem>> -> memref<1x128xf32, #tpu.memory_space<vmem>>
        %73 = tpu.memref_slice %arg7[%47] : memref<2x!tpu.dma_semaphore, #tpu.memory_space<semaphore_mem>> -> memref<1x!tpu.dma_semaphore, #tpu.memory_space<semaphore_mem>>
        %74 = tpu.memref_squeeze %73 : memref<1x!tpu.dma_semaphore, #tpu.memory_space<semaphore_mem>> -> memref<!tpu.dma_semaphore, #tpu.memory_space<semaphore_mem>>
        tpu.enqueue_dma source(%70 : memref<1x128xf32, #tpu.memory_space<any>>) target(%72 : memref<1x128xf32, #tpu.memory_space<vmem>>) target_semaphore(%74 : memref<!tpu.dma_semaphore, #tpu.memory_space<semaphore_mem>>)
        %c3_i32 = arith.constant 3 : i32
        %75 = arith.index_cast %c3_i32 : i32 to index
        %76 = arith.index_cast %50 : i32 to index
        %77 = memref.load %arg1[%75, %76] : memref<8x8xi32, #tpu.memory_space<smem>>
        %c0_i32_47 = arith.constant 0 : i32
        %78 = tpu.memref_slice %arg2[%77, %c0_i32_47] : memref<72x128xf32, #tpu.memory_space<any>> -> memref<1x128xf32, #tpu.memory_space<any>>
        %c0_i32_48 = arith.constant 0 : i32
        %79 = tpu.memref_slice %arg6[%47, %arg8, %c3_i32, %c0_i32_48] : memref<2x8x8x128xf32, #tpu.memory_space<vmem>> -> memref<1x1x1x128xf32, #tpu.memory_space<vmem>>
        %80 = tpu.memref_squeeze %79 : memref<1x1x1x128xf32, #tpu.memory_space<vmem>> -> memref<1x128xf32, #tpu.memory_space<vmem>>
        %81 = tpu.memref_slice %arg7[%47] : memref<2x!tpu.dma_semaphore, #tpu.memory_space<semaphore_mem>> -> memref<1x!tpu.dma_semaphore, #tpu.memory_space<semaphore_mem>>
        %82 = tpu.memref_squeeze %81 : memref<1x!tpu.dma_semaphore, #tpu.memory_space<semaphore_mem>> -> memref<!tpu.dma_semaphore, #tpu.memory_space<semaphore_mem>>
        tpu.enqueue_dma source(%78 : memref<1x128xf32, #tpu.memory_space<any>>) target(%80 : memref<1x128xf32, #tpu.memory_space<vmem>>) target_semaphore(%82 : memref<!tpu.dma_semaphore, #tpu.memory_space<semaphore_mem>>)
        %c4_i32 = arith.constant 4 : i32
        %83 = arith.index_cast %c4_i32 : i32 to index
        %84 = arith.index_cast %50 : i32 to index
        %85 = memref.load %arg1[%83, %84] : memref<8x8xi32, #tpu.memory_space<smem>>
        %c0_i32_49 = arith.constant 0 : i32
        %86 = tpu.memref_slice %arg2[%85, %c0_i32_49] : memref<72x128xf32, #tpu.memory_space<any>> -> memref<1x128xf32, #tpu.memory_space<any>>
        %c0_i32_50 = arith.constant 0 : i32
        %87 = tpu.memref_slice %arg6[%47, %arg8, %c4_i32, %c0_i32_50] : memref<2x8x8x128xf32, #tpu.memory_space<vmem>> -> memref<1x1x1x128xf32, #tpu.memory_space<vmem>>
        %88 = tpu.memref_squeeze %87 : memref<1x1x1x128xf32, #tpu.memory_space<vmem>> -> memref<1x128xf32, #tpu.memory_space<vmem>>
        %89 = tpu.memref_slice %arg7[%47] : memref<2x!tpu.dma_semaphore, #tpu.memory_space<semaphore_mem>> -> memref<1x!tpu.dma_semaphore, #tpu.memory_space<semaphore_mem>>
        %90 = tpu.memref_squeeze %89 : memref<1x!tpu.dma_semaphore, #tpu.memory_space<semaphore_mem>> -> memref<!tpu.dma_semaphore, #tpu.memory_space<semaphore_mem>>
        tpu.enqueue_dma source(%86 : memref<1x128xf32, #tpu.memory_space<any>>) target(%88 : memref<1x128xf32, #tpu.memory_space<vmem>>) target_semaphore(%90 : memref<!tpu.dma_semaphore, #tpu.memory_space<semaphore_mem>>)
        %c5_i32 = arith.constant 5 : i32
        %91 = arith.index_cast %c5_i32 : i32 to index
        %92 = arith.index_cast %50 : i32 to index
        %93 = memref.load %arg1[%91, %92] : memref<8x8xi32, #tpu.memory_space<smem>>
        %c0_i32_51 = arith.constant 0 : i32
        %94 = tpu.memref_slice %arg2[%93, %c0_i32_51] : memref<72x128xf32, #tpu.memory_space<any>> -> memref<1x128xf32, #tpu.memory_space<any>>
        %c0_i32_52 = arith.constant 0 : i32
        %95 = tpu.memref_slice %arg6[%47, %arg8, %c5_i32, %c0_i32_52] : memref<2x8x8x128xf32, #tpu.memory_space<vmem>> -> memref<1x1x1x128xf32, #tpu.memory_space<vmem>>
        %96 = tpu.memref_squeeze %95 : memref<1x1x1x128xf32, #tpu.memory_space<vmem>> -> memref<1x128xf32, #tpu.memory_space<vmem>>
        %97 = tpu.memref_slice %arg7[%47] : memref<2x!tpu.dma_semaphore, #tpu.memory_space<semaphore_mem>> -> memref<1x!tpu.dma_semaphore, #tpu.memory_space<semaphore_mem>>
        %98 = tpu.memref_squeeze %97 : memref<1x!tpu.dma_semaphore, #tpu.memory_space<semaphore_mem>> -> memref<!tpu.dma_semaphore, #tpu.memory_space<semaphore_mem>>
        tpu.enqueue_dma source(%94 : memref<1x128xf32, #tpu.memory_space<any>>) target(%96 : memref<1x128xf32, #tpu.memory_space<vmem>>) target_semaphore(%98 : memref<!tpu.dma_semaphore, #tpu.memory_space<semaphore_mem>>)
        %c6_i32 = arith.constant 6 : i32
        %99 = arith.index_cast %c6_i32 : i32 to index
        %100 = arith.index_cast %50 : i32 to index
        %101 = memref.load %arg1[%99, %100] : memref<8x8xi32, #tpu.memory_space<smem>>
        %c0_i32_53 = arith.constant 0 : i32
        %102 = tpu.memref_slice %arg2[%101, %c0_i32_53] : memref<72x128xf32, #tpu.memory_space<any>> -> memref<1x128xf32, #tpu.memory_space<any>>
        %c0_i32_54 = arith.constant 0 : i32
        %103 = tpu.memref_slice %arg6[%47, %arg8, %c6_i32, %c0_i32_54] : memref<2x8x8x128xf32, #tpu.memory_space<vmem>> -> memref<1x1x1x128xf32, #tpu.memory_space<vmem>>
        %104 = tpu.memref_squeeze %103 : memref<1x1x1x128xf32, #tpu.memory_space<vmem>> -> memref<1x128xf32, #tpu.memory_space<vmem>>
        %105 = tpu.memref_slice %arg7[%47] : memref<2x!tpu.dma_semaphore, #tpu.memory_space<semaphore_mem>> -> memref<1x!tpu.dma_semaphore, #tpu.memory_space<semaphore_mem>>
        %106 = tpu.memref_squeeze %105 : memref<1x!tpu.dma_semaphore, #tpu.memory_space<semaphore_mem>> -> memref<!tpu.dma_semaphore, #tpu.memory_space<semaphore_mem>>
        tpu.enqueue_dma source(%102 : memref<1x128xf32, #tpu.memory_space<any>>) target(%104 : memref<1x128xf32, #tpu.memory_space<vmem>>) target_semaphore(%106 : memref<!tpu.dma_semaphore, #tpu.memory_space<semaphore_mem>>)
        %c7_i32 = arith.constant 7 : i32
        %107 = arith.index_cast %c7_i32 : i32 to index
        %108 = arith.index_cast %50 : i32 to index
        %109 = memref.load %arg1[%107, %108] : memref<8x8xi32, #tpu.memory_space<smem>>
        %c0_i32_55 = arith.constant 0 : i32
        %110 = tpu.memref_slice %arg2[%109, %c0_i32_55] : memref<72x128xf32, #tpu.memory_space<any>> -> memref<1x128xf32, #tpu.memory_space<any>>
        %c0_i32_56 = arith.constant 0 : i32
        %111 = tpu.memref_slice %arg6[%47, %arg8, %c7_i32, %c0_i32_56] : memref<2x8x8x128xf32, #tpu.memory_space<vmem>> -> memref<1x1x1x128xf32, #tpu.memory_space<vmem>>
        %112 = tpu.memref_squeeze %111 : memref<1x1x1x128xf32, #tpu.memory_space<vmem>> -> memref<1x128xf32, #tpu.memory_space<vmem>>
        %113 = tpu.memref_slice %arg7[%47] : memref<2x!tpu.dma_semaphore, #tpu.memory_space<semaphore_mem>> -> memref<1x!tpu.dma_semaphore, #tpu.memory_space<semaphore_mem>>
        %114 = tpu.memref_squeeze %113 : memref<1x!tpu.dma_semaphore, #tpu.memory_space<semaphore_mem>> -> memref<!tpu.dma_semaphore, #tpu.memory_space<semaphore_mem>>
        tpu.enqueue_dma source(%110 : memref<1x128xf32, #tpu.memory_space<any>>) target(%112 : memref<1x128xf32, #tpu.memory_space<vmem>>) target_semaphore(%114 : memref<!tpu.dma_semaphore, #tpu.memory_space<semaphore_mem>>)
        %c8_i32_57 = arith.constant 8 : i32
      }
      %c8_i32_37 = arith.constant 8 : i32
    } else {
    }
    %c1_i32_10 = arith.constant 1 : i32
    %16 = arith.subi %c1_i32_10, %11 : i32
    %c0_i32_11 = arith.constant 0 : i32
    %c0_i32_12 = arith.constant 0 : i32
    %c0_i32_13 = arith.constant 0 : i32
    %17 = tpu.memref_slice %arg6[%16, %c0_i32_11, %c0_i32_12, %c0_i32_13] : memref<2x8x8x128xf32, #tpu.memory_space<vmem>> -> memref<1x8x8x128xf32, #tpu.memory_space<vmem>>
    %18 = tpu.memref_squeeze %17 : memref<1x8x8x128xf32, #tpu.memory_space<vmem>> -> memref<8x8x128xf32, #tpu.memory_space<vmem>>
    %c0_i32_14 = arith.constant 0 : i32
    %c0_i32_15 = arith.constant 0 : i32
    %c0_i32_16 = arith.constant 0 : i32
    %19 = tpu.memref_slice %arg6[%11, %c0_i32_14, %c0_i32_15, %c0_i32_16] : memref<2x8x8x128xf32, #tpu.memory_space<vmem>> -> memref<1x8x8x128xf32, #tpu.memory_space<vmem>>
    %20 = tpu.memref_squeeze %19 : memref<1x8x8x128xf32, #tpu.memory_space<vmem>> -> memref<8x8x128xf32, #tpu.memory_space<vmem>>
    %21 = tpu.memref_slice %arg7[%11] : memref<2x!tpu.dma_semaphore, #tpu.memory_space<semaphore_mem>> -> memref<1x!tpu.dma_semaphore, #tpu.memory_space<semaphore_mem>>
    %22 = tpu.memref_squeeze %21 : memref<1x!tpu.dma_semaphore, #tpu.memory_space<semaphore_mem>> -> memref<!tpu.dma_semaphore, #tpu.memory_space<semaphore_mem>>
    tpu.wait_dma2 semaphore(%22 : memref<!tpu.dma_semaphore, #tpu.memory_space<semaphore_mem>>) src(%18 : memref<8x8x128xf32, #tpu.memory_space<vmem>>) dst(%20 : memref<8x8x128xf32, #tpu.memory_space<vmem>>)
    %23 = arith.index_cast %11 : i32 to index
    %c0 = arith.constant 0 : index
    %c0_17 = arith.constant 0 : index
    %c0_18 = arith.constant 0 : index
    %24 = vector.load %arg6[%23, %c0, %c0_17, %c0_18] : memref<2x8x8x128xf32, #tpu.memory_space<vmem>>, vector<1x8x8x128xf32>
    %25 = vector.shape_cast %24 : vector<1x8x8x128xf32> to vector<8x8x128xf32>
    %cst_19 = arith.constant dense<0.000000e+00> : vector<8x128xf32>
    %26 = vector.multi_reduction <add>, %25, %cst_19 [0] : vector<8x8x128xf32> to vector<8x128xf32>
    %27 = arith.addf %1, %26 : vector<8x128xf32>
    %c1_i32_20 = arith.constant 1 : i32
    %cst_21 = arith.constant 1.250000e-01 : f32
    %28 = vector.broadcast %cst_21 : f32 to vector<8x128xf32>
    %29 = arith.mulf %27, %28 : vector<8x128xf32>
    %c0_22 = arith.constant 0 : index
    %c0_23 = arith.constant 0 : index
    %30 = vector.load %arg3[%c0_22, %c0_23] : memref<128x128xf32, #tpu.memory_space<vmem>>, vector<128x128xf32>
    %cst_24 = arith.constant dense<0.000000e+00> : vector<8x128xf32>
    %31 = tpu.matmul %29, %30, %cst_24 {dimension_numbers = #tpu.dot_dimension_numbers<[1], [0], [0], [1], [0, 0, 1, 1], [], []>} : vector<8x128xf32>, vector<128x128xf32>, vector<8x128xf32> -> vector<8x128xf32>
    %c0_25 = arith.constant 0 : index
    %c0_26 = arith.constant 0 : index
    %32 = vector.load %arg4[%c0_25, %c0_26] : memref<1x128xf32, #tpu.memory_space<vmem>>, vector<1x128xf32>
    %33 = vector.broadcast %32 : vector<1x128xf32> to vector<8x128xf32>
    %34 = arith.addf %31, %33 : vector<8x128xf32>
    %cst_27 = arith.constant dense<0xFF800000> : vector<8xf32>
    %35 = vector.multi_reduction <maximumf>, %34, %cst_27 [1] : vector<8x128xf32> to vector<8xf32>
    %36 = vector.shape_cast %35 : vector<8xf32> to vector<8x1xf32>
    %37 = vector.broadcast %36 : vector<8x1xf32> to vector<8x128xf32>
    %38 = arith.subf %34, %37 : vector<8x128xf32>
    %39 = math.exp %38 : vector<8x128xf32>
    %cst_28 = arith.constant dense<0.000000e+00> : vector<8xf32>
    %40 = vector.multi_reduction <add>, %39, %cst_28 [1] : vector<8x128xf32> to vector<8xf32>
    %41 = vector.shape_cast %40 : vector<8xf32> to vector<8x1xf32>
    %42 = tpu.reciprocal %41 {approx = true} : vector<8x1xf32> -> vector<8x1xf32>
    %43 = vector.broadcast %42 : vector<8x1xf32> to vector<8x128xf32>
    %44 = arith.mulf %39, %43 : vector<8x128xf32>
    %c0_29 = arith.constant 0 : index
    %c0_30 = arith.constant 0 : index
    %45 = vector.load %arg5[%c0_29, %c0_30] : memref<8x128xf32, #tpu.memory_space<vmem>>, vector<8x128xf32>
    tpu.vector_store %arg5[%c0_29, %c0_30], %44 {strides = array<i32>} : memref<8x128xf32, #tpu.memory_space<vmem>>, vector<8x128xf32>,
    return
  }
  func.func @transform_0(%arg0: i32) -> (i32, i32) {
    %c0_i32 = arith.constant 0 : i32
    %c0_i32_0 = arith.constant 0 : i32
    return %arg0, %c0_i32 : i32, i32
  }
  func.func @transform_2(%arg0: i32) -> (i32, i32) {
    %c0_i32 = arith.constant 0 : i32
    %c0_i32_0 = arith.constant 0 : i32
    %c0_i32_1 = arith.constant 0 : i32
    return %c0_i32, %c0_i32_0 : i32, i32
  }
  func.func @transform_3(%arg0: i32) -> (i32, i32) {
    %c0_i32 = arith.constant 0 : i32
    %c0_i32_0 = arith.constant 0 : i32
    %c0_i32_1 = arith.constant 0 : i32
    return %c0_i32, %c0_i32_0 : i32, i32
  }
  func.func @transform_4(%arg0: i32) -> (i32, i32) {
    %c0_i32 = arith.constant 0 : i32
    %c0_i32_0 = arith.constant 0 : i32
    return %arg0, %c0_i32 : i32, i32
  }
}

</mosaic_0001>

<bundles_post_ra>
// kernel: tpu_custom_call.1
= control target key start
LH: loop header
LB: loop body
LE: loop exit
PB: predicated region body
PF: predicated region fallthrough
CT: control target
= control target key end

     0   :  { %9 = vsyncpa [#allocation7], 0  ;;  %s1032_s0 = inlined_call_operand.hbm [shape: s32[8,8], index: 0, kind: input, shape index: {}]   ;;  %s1033_s1 = inlined_call_operand.hbm [shape: f32[72,128], index: 1, kind: input, shape index: {}]   ;;  %s1034_s2 = inlined_call_operand.hbm [shape: f32[128,128], index: 2, kind: input, shape index: {}]   ;;  %s1035_s3 = inlined_call_operand.vmem [shape: f32[1,128], index: 3, kind: input, shape index: {}]   ;;  %s1036_s4 = inlined_call_operand.hbm [shape: f32[8,128], index: 4, kind: output, shape index: {}]  }
   0x1   :  { %10 = vsyncpa [#allocation5], 0 }
   0x2   :  { %11 = vsyncpa [#allocation6], 0  ;;  %s533_s17 = scalar_lea.hbm %s1032_s0, 128 }
   0x3   :  { %p534_p0 = scmp.ne.s32.totalorder %s1032_s0, %s533_s17  ;;  %p537_p1 = scmp.lt.u32.totalorder %s533_s17, %s1032_s0 }
   0x5   :  { %p539_p2 = pnand %p537_p1, %p534_p0 }
   0x7   :  { %542 = shalt.err (!%p539_p2)
}
   0x8   :  { %s795_s22 = smov [#allocation4]   ;;  %s796_s25 = smov [#allocation8]  }
   0x9   :  { %19 = dma.hbm_to_smem %s1032_s0, 128, %s795_s22, [#allocation7]  }
   0xa   :  { %s25_s26 = sshll.u32 %s796_s25, 4  ;;  %s543_s29 = scalar_lea.hbm %s1034_s2, 2048  ;;  %s26_s26 = int_to_ptr.vmem [resolvable:$true] %s25_s26 }
   0xb   :  { %p544_p3 = scmp.ne.s32.totalorder %s1034_s2, %s543_s29  ;;  %p547_p4 = scmp.lt.u32.totalorder %s543_s29, %s1034_s2 }
   0xd   :  { %p549_p5 = pnand %p547_p4, %p544_p3 }
   0xf   :  { %552 = shalt.err (!%p549_p5)
}
  0x10   :  { %s553_s8 = scalar_lea.vmem %s26_s26, 2048  ;;  %p558_p7 = scmp.lt.s32.totalorder %s26_s26, %s26_s26 }
  0x11   :  { %p554_p6 = scmp.ne.s32.totalorder %s26_s26, %s553_s8  ;;  %p559_p8 = scmp.lt.s32.totalorder %s553_s8, %s553_s8 }
  0x13   :  { %p560_p9 = por %p559_p8, %p558_p7 }
  0x15   :  { %p561_p10 = pnand %p560_p9, %p554_p6 }
  0x17   :  { %564 = shalt.err (!%p561_p10)
}
  0x18   :  { %s797_s0 = smov 128   ;;  %s798_s9 = smov 8  }
  0x19   :  { %31 = dma.hbm_to_vmem [thread:$0]  %s1034_s2, 2048, %s26_s26, [#allocation5], %s797_s0, %s797_s0, %s798_s9  }
  0x1a   :  { %783 = dma.done.wait [#allocation7], 128  }
  0x1b   :  { %784 = vsyncadd [#allocation7], 4294967168 }
  0x1c   :  { %785 = dma.done.wait [#allocation5], 2048  }
  0x1d   :  { %786 = vsyncadd [#allocation5], 4294965248 }
  0x1e   :  { %40 = sfence }
  0x1f   :  { %s853_s12 = smov 0  }
  0x20 LB: > { %s47_s13 = sld [smem:[#allocation4 + %s793_s12]]  ;;  %s398_s14 = sshll.u32 %s793_s12, 3  ;;  %s793_s12 = sphi %s853_s12, %s46_s12  }
  0x21   : > { %s63_s15 = sshra.s32 %s793_s12, 7  ;;  %s861_s2 = scalar_lea.vmem [#allocation2], %s398_s14 }
  0x22   : > { %s59_s16 = sshll.u32 %s861_s2, 4  ;;  %s864_s17 = sshll.u32 %s63_s15, 7  ;;  %s866_s16 = int_to_ptr.vmem [resolvable:$true] %s59_s16 }
  0x23   : > { %s869_s18 = sand.u32 127, %s793_s12  ;;  %s424_s19 = sadd.s32 128, %s864_s17 }
  0x24   : > { %s361_s20 = scalar_lea.vmem %s861_s2, 1 [#allocation2]  ;;  %s69_s21 = sadd.s32 %s424_s19, %s869_s18 }
  0x25   : > { %s82_s22 = sshll.u32 %s361_s20, 4  ;;  %s874_s24 = sld [smem:[#allocation4 + %s69_s21]]  ;;  %s879_s22 = int_to_ptr.vmem [resolvable:$true] %s82_s22 }
  0x26   : > { %s397_s23 = sshll.u32 %s47_s13, 4  ;;  %s884_s5 = scalar_lea.hbm %s1033_s1, 1152 }
  0x27   : > { %s49_s27 = scalar_lea.hbm %s1033_s1, %s397_s23 }
  0x28   : > { %s565_s28 = scalar_lea.hbm %s49_s27, 16  ;;  %p568_p12 = scmp.lt.u32.totalorder %s49_s27, %s1033_s1 }
  0x29   : > { %p566_p11 = scmp.ne.s32.totalorder %s49_s27, %s565_s28  ;;  %p569_p13 = scmp.lt.u32.totalorder %s884_s5, %s565_s28 }
  0x2a   : > { %p571_p1 = scmp.lt.u32.totalorder %s565_s28, %s49_s27 }
  0x2b   : > { %p570_p0 = por %p569_p13, %p568_p12 }
  0x2d   : > { %p572_p2 = por %p571_p1, %p570_p0 }
  0x2f   : > { %p573_p3 = pnand %p572_p2, %p566_p11 }
  0x31   : > { %576 = shalt.err (!%p573_p3)  }
  0x32   : > { %s577_s8 = scalar_lea.vmem %s866_s16, 16  ;;  %s799_s0 = smov [#allocation2]  }
  0x33   : > { %p578_p4 = scmp.ne.s32.totalorder %s866_s16, %s577_s8  ;;  %s579_s9 = sshll.u32 %s799_s0, 4  ;;  %s892_s9 = int_to_ptr.vmem [resolvable:$false] %s579_s9 }
  0x34   : > { %s895_s10 = scalar_lea.vmem %s892_s9, 2048  ;;  %p582_p5 = scmp.lt.s32.totalorder %s866_s16, %s892_s9 }
  0x35   : > { %p583_p6 = scmp.lt.s32.totalorder %s895_s10, %s577_s8 }
  0x37   : > { %p584_p7 = por %p583_p6, %p582_p5 }
  0x39   : > { %p585_p8 = pnand %p584_p7, %p578_p4 }
  0x3b   : > { %588 = shalt.err (!%p585_p8)  }
  0x3c   : > { %62 = dma.hbm_to_vmem [thread:$0]  %s49_s27, 16, %s866_s16, [#allocation3] }
  0x3d   : > { %s426_s11 = sadd.s32 256, %s864_s17  ;;  %s366_s13 = scalar_lea.vmem %s861_s2, 2 [#allocation2] }
  0x3e   : > { %s88_s14 = sadd.s32 %s426_s11, %s869_s18  ;;  %s101_s15 = sshll.u32 %s366_s13, 4  ;;  %s906_s15 = int_to_ptr.vmem [resolvable:$true] %s101_s15 }
  0x3f   : > { %s904_s19 = sld [smem:[#allocation4 + %s88_s14]]  ;;  %s400_s20 = sshll.u32 %s874_s24, 4 }
  0x40   : > { %s428_s21 = sadd.s32 384, %s864_s17  ;;  %s72_s26 = scalar_lea.hbm %s1033_s1, %s400_s20 }
  0x41   : > { %s107_s28 = sadd.s32 %s428_s21, %s869_s18  ;;  %s589_s29 = scalar_lea.hbm %s72_s26, 16 }
  0x42   : > { %p590_p9 = scmp.ne.s32.totalorder %s72_s26, %s589_s29  ;;  %p592_p10 = scmp.lt.u32.totalorder %s72_s26, %s1033_s1 }
  0x43   : > { %p593_p11 = scmp.lt.u32.totalorder %s884_s5, %s589_s29  ;;  %p595_p13 = scmp.lt.u32.totalorder %s589_s29, %s72_s26 }
  0x45   : > { %p594_p12 = por %p593_p11, %p592_p10 }
  0x47   : > { %p596_p0 = por %p595_p13, %p594_p12 }
  0x49   : > { %p597_p1 = pnand %p596_p0, %p590_p9 }
  0x4b   : > { %600 = shalt.err (!%p597_p1)  }
  0x4c   : > { %s601_s16 = scalar_lea.vmem %s879_s22, 16  ;;  %p606_p3 = scmp.lt.s32.totalorder %s879_s22, %s892_s9 }
  0x4d   : > { %p602_p2 = scmp.ne.s32.totalorder %s879_s22, %s601_s16  ;;  %p607_p4 = scmp.lt.s32.totalorder %s895_s10, %s601_s16 }
  0x4f   : > { %p608_p5 = por %p607_p4, %p606_p3 }
  0x51   : > { %p609_p6 = pnand %p608_p5, %p602_p2 }
  0x53   : > { %612 = shalt.err (!%p609_p6)  }
  0x54   : > { %85 = dma.hbm_to_vmem [thread:$0]  %s72_s26, 16, %s879_s22, [#allocation3] }
  0x55   : > { %s924_s24 = sld [smem:[#allocation4 + %s107_s28]]  ;;  %s371_s27 = scalar_lea.vmem %s861_s2, 3 [#allocation2] }
  0x56   : > { %s120_s7 = sshll.u32 %s371_s27, 4  ;;  %s430_s8 = sadd.s32 512, %s864_s17  ;;  %s929_s7 = int_to_ptr.vmem [resolvable:$true] %s120_s7 }
  0x57   : > { %s403_s0 = sshll.u32 %s904_s19, 4  ;;  %s126_s20 = sadd.s32 %s430_s8, %s869_s18 }
  0x58   : > { %s91_s14 = scalar_lea.hbm %s1033_s1, %s403_s0 }
  0x59   : > { %s613_s21 = scalar_lea.hbm %s91_s14, 16  ;;  %p616_p8 = scmp.lt.u32.totalorder %s91_s14, %s1033_s1 }
  0x5a   : > { %p614_p7 = scmp.ne.s32.totalorder %s91_s14, %s613_s21  ;;  %p617_p9 = scmp.lt.u32.totalorder %s884_s5, %s613_s21 }
  0x5b   : > { %p619_p11 = scmp.lt.u32.totalorder %s613_s21, %s91_s14 }
  0x5c   : > { %p618_p10 = por %p617_p9, %p616_p8 }
  0x5e   : > { %p620_p12 = por %p619_p11, %p618_p10 }
  0x60   : > { %p621_p13 = pnand %p620_p12, %p614_p7 }
  0x62   : > { %624 = shalt.err (!%p621_p13)  }
  0x63   : > { %s625_s22 = scalar_lea.vmem %s906_s15, 16  ;;  %p630_p1 = scmp.lt.s32.totalorder %s906_s15, %s892_s9 }
  0x64   : > { %p626_p0 = scmp.ne.s32.totalorder %s906_s15, %s625_s22  ;;  %p631_p2 = scmp.lt.s32.totalorder %s895_s10, %s625_s22 }
  0x66   : > { %p632_p3 = por %p631_p2, %p630_p1 }
  0x68   : > { %p633_p4 = pnand %p632_p3, %p626_p0 }
  0x6a   : > { %636 = shalt.err (!%p633_p4)  }
  0x6b   : > { %104 = dma.hbm_to_vmem [thread:$0]  %s91_s14, 16, %s906_s15, [#allocation3] }
  0x6c   : > { %s945_s19 = sld [smem:[#allocation4 + %s126_s20]]  ;;  %s376_s26 = scalar_lea.vmem %s861_s2, 4 [#allocation2] }
  0x6d   : > { %s406_s28 = sshll.u32 %s924_s24, 4  ;;  %s139_s16 = sshll.u32 %s376_s26, 4  ;;  %s140_s16 = int_to_ptr.vmem [resolvable:$true] %s139_s16 }
  0x6e   : > { %s110_s6 = scalar_lea.hbm %s1033_s1, %s406_s28 }
  0x6f   : > { %s637_s27 = scalar_lea.hbm %s110_s6, 16  ;;  %p640_p6 = scmp.lt.u32.totalorder %s110_s6, %s1033_s1 }
  0x70   : > { %p638_p5 = scmp.ne.s32.totalorder %s110_s6, %s637_s27  ;;  %p641_p7 = scmp.lt.u32.totalorder %s884_s5, %s637_s27 }
  0x71   : > { %p643_p9 = scmp.lt.u32.totalorder %s637_s27, %s110_s6 }
  0x72   : > { %p642_p8 = por %p641_p7, %p640_p6 }
  0x74   : > { %p644_p10 = por %p643_p9, %p642_p8 }
  0x76   : > { %p645_p11 = pnand %p644_p10, %p638_p5 }
  0x78   : > { %648 = shalt.err (!%p645_p11)  }
  0x79   : > { %s649_s15 = scalar_lea.vmem %s929_s7, 16  ;;  %p654_p13 = scmp.lt.s32.totalorder %s929_s7, %s892_s9 }
  0x7a   : > { %p650_p12 = scmp.ne.s32.totalorder %s929_s7, %s649_s15  ;;  %p655_p0 = scmp.lt.s32.totalorder %s895_s10, %s649_s15 }
  0x7c   : > { %p656_p1 = por %p655_p0, %p654_p13 }
  0x7e   : > { %p657_p2 = pnand %p656_p1, %p650_p12 }
  0x80   : > { %660 = shalt.err (!%p657_p2)  }
  0x81   : > { %123 = dma.hbm_to_vmem [thread:$0]  %s110_s6, 16, %s929_s7, [#allocation3] }
  0x82   : > { %s432_s24 = sadd.s32 640, %s864_s17  ;;  %s381_s11 = scalar_lea.vmem %s861_s2, 5 [#allocation2] }
  0x83   : > { %s145_s13 = sadd.s32 %s432_s24, %s869_s18  ;;  %s409_s14 = sshll.u32 %s945_s19, 4 }
  0x84   : > { %s966_s20 = sld [smem:[#allocation4 + %s145_s13]]  ;;  %s129_s25 = scalar_lea.hbm %s1033_s1, %s409_s14 }
  0x85   : > { %s158_s22 = sshll.u32 %s381_s11, 4  ;;  %s661_s26 = scalar_lea.hbm %s129_s25, 16  ;;  %s159_s22 = int_to_ptr.vmem [resolvable:$true] %s158_s22 }
  0x86   : > { %p662_p3 = scmp.ne.s32.totalorder %s129_s25, %s661_s26  ;;  %p664_p4 = scmp.lt.u32.totalorder %s129_s25, %s1033_s1 }
  0x87   : > { %p665_p5 = scmp.lt.u32.totalorder %s884_s5, %s661_s26  ;;  %p667_p7 = scmp.lt.u32.totalorder %s661_s26, %s129_s25 }
  0x89   : > { %p666_p6 = por %p665_p5, %p664_p4 }
  0x8b   : > { %p668_p8 = por %p667_p7, %p666_p6 }
  0x8d   : > { %p669_p9 = pnand %p668_p8, %p662_p3 }
  0x8f   : > { %672 = shalt.err (!%p669_p9)  }
  0x90   : > { %s673_s7 = scalar_lea.vmem %s140_s16, 16  ;;  %p678_p11 = scmp.lt.s32.totalorder %s140_s16, %s892_s9 }
  0x91   : > { %p674_p10 = scmp.ne.s32.totalorder %s140_s16, %s673_s7  ;;  %p679_p12 = scmp.lt.s32.totalorder %s895_s10, %s673_s7 }
  0x93   : > { %p680_p13 = por %p679_p12, %p678_p11 }
  0x95   : > { %p681_p0 = pnand %p680_p13, %p674_p10 }
  0x97   : > { %684 = shalt.err (!%p681_p0)  }
  0x98   : > { %142 = dma.hbm_to_vmem [thread:$0]  %s129_s25, 16, %s140_s16, [#allocation3] }
  0x99   : > { %s434_s19 = sadd.s32 768, %s864_s17  ;;  %s386_s30 = scalar_lea.vmem %s861_s2, 6 [#allocation2] }
  0x9a   : > { %s164_s6 = sadd.s32 %s434_s19, %s869_s18  ;;  %s177_s8 = sshll.u32 %s386_s30, 4  ;;  %s178_s8 = int_to_ptr.vmem [resolvable:$true] %s177_s8 }
  0x9b   : > { %s980_s27 = sld [smem:[#allocation4 + %s164_s6]]  ;;  %s412_s0 = sshll.u32 %s966_s20, 4 }
  0x9c   : > { %s436_s15 = sadd.s32 896, %s864_s17  ;;  %s148_s16 = scalar_lea.hbm %s1033_s1, %s412_s0 }
  0x9d   : > { %s183_s13 = sadd.s32 %s436_s15, %s869_s18  ;;  %s685_s14 = scalar_lea.hbm %s148_s16, 16 }
  0x9e   : > { %p686_p1 = scmp.ne.s32.totalorder %s148_s16, %s685_s14  ;;  %p688_p2 = scmp.lt.u32.totalorder %s148_s16, %s1033_s1 }
  0x9f   : > { %p689_p3 = scmp.lt.u32.totalorder %s884_s5, %s685_s14  ;;  %p691_p5 = scmp.lt.u32.totalorder %s685_s14, %s148_s16 }
  0xa1   : > { %p690_p4 = por %p689_p3, %p688_p2 }
  0xa3   : > { %p692_p6 = por %p691_p5, %p690_p4 }
  0xa5   : > { %p693_p7 = pnand %p692_p6, %p686_p1 }
  0xa7   : > { %696 = shalt.err (!%p693_p7)  }
  0xa8   : > { %s697_s25 = scalar_lea.vmem %s159_s22, 16  ;;  %p702_p9 = scmp.lt.s32.totalorder %s159_s22, %s892_s9 }
  0xa9   : > { %p698_p8 = scmp.ne.s32.totalorder %s159_s22, %s697_s25  ;;  %p703_p10 = scmp.lt.s32.totalorder %s895_s10, %s697_s25 }
  0xab   : > { %p704_p11 = por %p703_p10, %p702_p9 }
  0xad   : > { %p705_p12 = pnand %p704_p11, %p698_p8 }
  0xaf   : > { %708 = shalt.err (!%p705_p12)  }
  0xb0   : > { %161 = dma.hbm_to_vmem [thread:$0]  %s148_s16, 16, %s159_s22, [#allocation3] }
  0xb1   : > { %s184_s17 = sld [smem:[#allocation4 + %s183_s13]]  ;;  %s391_s18 = scalar_lea.vmem %s861_s2, 7 [#allocation2] }
  0xb2   : > { %s415_s20 = sshll.u32 %s980_s27, 4  ;;  %s196_s26 = sshll.u32 %s391_s18, 4  ;;  %s197_s26 = int_to_ptr.vmem [resolvable:$true] %s196_s26 }
  0xb3   : > { %s167_s7 = scalar_lea.hbm %s1033_s1, %s415_s20 }
  0xb4   : > { %s709_s19 = scalar_lea.hbm %s167_s7, 16  ;;  %p712_p0 = scmp.lt.u32.totalorder %s167_s7, %s1033_s1 }
  0xb5   : > { %p710_p13 = scmp.ne.s32.totalorder %s167_s7, %s709_s19  ;;  %p713_p1 = scmp.lt.u32.totalorder %s884_s5, %s709_s19 }
  0xb6   : > { %p715_p3 = scmp.lt.u32.totalorder %s709_s19, %s167_s7 }
  0xb7   : > { %p714_p2 = por %p713_p1, %p712_p0 }
  0xb9   : > { %p716_p4 = por %p715_p3, %p714_p2 }
  0xbb   : > { %p717_p5 = pnand %p716_p4, %p710_p13 }
  0xbd   : > { %720 = shalt.err (!%p717_p5)  }
  0xbe   : > { %s721_s2 = scalar_lea.vmem %s178_s8, 16  ;;  %p726_p7 = scmp.lt.s32.totalorder %s178_s8, %s892_s9 }
  0xbf   : > { %p722_p6 = scmp.ne.s32.totalorder %s178_s8, %s721_s2  ;;  %p727_p8 = scmp.lt.s32.totalorder %s895_s10, %s721_s2 }
  0xc1   : > { %p728_p9 = por %p727_p8, %p726_p7 }
  0xc3   : > { %p729_p10 = pnand %p728_p9, %p722_p6 }
  0xc5   : > { %732 = shalt.err (!%p729_p10)  }
  0xc6   : > { %180 = dma.hbm_to_vmem [thread:$0]  %s167_s7, 16, %s178_s8, [#allocation3] }
  0xc7   : > { %s418_s22 = sshll.u32 %s184_s17, 4 }
  0xc8   : > { %s186_s15 = scalar_lea.hbm %s1033_s1, %s418_s22 }
  0xc9   : > { %s733_s24 = scalar_lea.hbm %s186_s15, 16  ;;  %p736_p12 = scmp.lt.u32.totalorder %s186_s15, %s1033_s1 }
  0xca   : > { %p734_p11 = scmp.ne.s32.totalorder %s186_s15, %s733_s24  ;;  %p737_p13 = scmp.lt.u32.totalorder %s884_s5, %s733_s24 }
  0xcb   : > { %p739_p1 = scmp.lt.u32.totalorder %s733_s24, %s186_s15 }
  0xcc   : > { %p738_p0 = por %p737_p13, %p736_p12 }
  0xce   : > { %p740_p2 = por %p739_p1, %p738_p0 }
  0xd0   : > { %p741_p3 = pnand %p740_p2, %p734_p11 }
  0xd2   : > { %744 = shalt.err (!%p741_p3)  }
  0xd3   : > { %s745_s8 = scalar_lea.vmem %s197_s26, 16  ;;  %p750_p5 = scmp.lt.s32.totalorder %s197_s26, %s892_s9 }
  0xd4   : > { %p746_p4 = scmp.ne.s32.totalorder %s197_s26, %s745_s8  ;;  %p751_p6 = scmp.lt.s32.totalorder %s895_s10, %s745_s8 }
  0xd6   : > { %p752_p7 = por %p751_p6, %p750_p5 }
  0xd8   : > { %p753_p8 = pnand %p752_p7, %p746_p4 }
  0xda   : > { %756 = shalt.err (!%p753_p8)  }
  0xdb   : > { %199 = dma.hbm_to_vmem [thread:$0]  %s186_s15, 16, %s197_s26, [#allocation3] }
  0xdc   : > { %s46_s12 = sadd.s32 1, %s793_s12  }
  0xdd   : > { %p43_p9 = scmp.ge.s32.totalorder %s46_s12, 8  }
  0xdf   :  { %45 = sbr.rel (!%p43_p9) target bundleno = 32 (0x20), region = 96 }
  0xe6   :  { %787 = dma.done.wait [#allocation3], 1024 }
  0xe7   :  { %788 = vsyncadd [#allocation3], 4294966272  ;;  %v800_v0 = vmov 0.0|0.0   ;;  %vm801_vm0 = vmmov 0   ;;  %v802_v1 = vmov 0.0   ;;  %v221_v2 = vld [vmem:[#allocation8] sm:$0xff] }
  0xe8   :  { %489 = vmatprep.subr.bf16.mxu0 %v800_v0  ;;  %486 = vmatprep.mubr.msk.f32.mxu0 %vm801_vm0, %v802_v1  ;;  %v222_v3 = vld [vmem:[#allocation8 + $0x8] sm:$0xff]  ;;  %v223_v4 = vld [vmem:[#allocation8 + $0x10] sm:$0xff]  ;;  %v224_v6 = vld [vmem:[#allocation8 + $0x18] sm:$0xff]  ;;  %s803_s5 = smov [#allocation9]  }
  0xe9   :  { %v490_v5 = vpack.c.bf16 %v222_v3, %v221_v2  ;;  %v493_v7 = vpack.c.bf16 %v224_v6, %v223_v4  ;;  %v225_v8 = vld [vmem:[#allocation8 + $0x20] sm:$0xff]  ;;  %v226_v9 = vld [vmem:[#allocation8 + $0x28] sm:$0xff]  ;;  %v206_v12 = vld [vmem:[#allocation2 + $0x10] sm:$0xff]  ;;  %s330_s9 = sshll.u32 %s803_s5, 4  ;;  %s331_s9 = int_to_ptr.vmem [resolvable:$true] %s330_s9 }
  0xea   :  { %v204_v10 = vld [vmem:[#allocation2] sm:$0xff]  ;;  %v205_v11 = vld [vmem:[#allocation2 + $0x8] sm:$0xff]  ;;  %v496_v14 = vpack.c.bf16 %v226_v9, %v225_v8  ;;  %v207_v15 = vld [vmem:[#allocation2 + $0x18] sm:$0xff]  ;;  %s757_s10 = scalar_lea.vmem %s331_s9, 128  ;;  %p762_p11 = scmp.lt.s32.totalorder %s331_s9, %s331_s9 }
  0xeb   :  { %491 = vmatpush3.bf16.msra.mxu0 %v490_v5  ;;  %v212_v13 = vadd.f32 %v205_v11, %v204_v10  ;;  %v227_v16 = vld [vmem:[#allocation8 + $0x30] sm:$0xff]  ;;  %v228_v17 = vld [vmem:[#allocation8 + $0x38] sm:$0xff]  ;;  %v208_v21 = vld [vmem:[#allocation2 + $0x20] sm:$0xff]  ;;  %p758_p10 = scmp.ne.s32.totalorder %s331_s9, %s757_s10  ;;  %p763_p12 = scmp.lt.s32.totalorder %s757_s10, %s757_s10 }
  0xec   :  { %492 = vmatprep.subr.bf16.mxu0 %v800_v0  ;;  %v499_v20 = vpack.c.bf16 %v228_v17, %v227_v16  ;;  %v229_v22 = vld [vmem:[#allocation8 + $0x40] sm:$0xff]  ;;  %v230_v23 = vld [vmem:[#allocation8 + $0x48] sm:$0xff]  ;;  %v231_v27 = vld [vmem:[#allocation8 + $0x50] sm:$0xff] }
  0xed   :  { %v213_v18 = vadd.f32 %v212_v13, %v206_v12  ;;  %v502_v25 = vpack.c.bf16 %v230_v23, %v229_v22  ;;  %v209_v26 = vld [vmem:[#allocation2 + $0x28] sm:$0xff]  ;;  %v232_v28 = vld [vmem:[#allocation8 + $0x58] sm:$0xff]  ;;  %v210_v31 = vld [vmem:[#allocation2 + $0x30] sm:$0xff]  ;;  %p764_p13 = por %p763_p12, %p762_p11 }
  0xee   :  { %v505_v30 = vpack.c.bf16 %v232_v28, %v231_v27  ;;  %v233_v32 = vld [vmem:[#allocation8 + $0x60] sm:$0xff]  ;;  %v234_v33 = vld [vmem:[#allocation8 + $0x68] sm:$0xff]  ;;  %v211_v36 = vld [vmem:[#allocation2 + $0x38] sm:$0xff] }
  0xef   :  { %494 = vmatpush3.bf16.msra.mxu0 %v493_v7  ;;  %v214_v19 = vadd.f32 %v213_v18, %v207_v15  ;;  %v508_v35 = vpack.c.bf16 %v234_v33, %v233_v32  ;;  %v235_v37 = vld [vmem:[#allocation8 + $0x70] sm:$0xff]  ;;  %v236_v38 = vld [vmem:[#allocation8 + $0x78] sm:$0xff]  ;;  %v420_v42 = vld [vmem:[%s1035_s3] ss:$0 sm:$0xff]  ;;  %p765_p0 = pnand %p764_p13, %p758_p10 }
  0xf0   :  { %495 = vmatprep.subr.bf16.mxu0 %v800_v0  ;;  %v511_v40 = vpack.c.bf16 %v236_v38, %v235_v37 }
  0xf1   :  { %v215_v24 = vadd.f32 %v214_v19, %v208_v21 }
  0xf3   :  { %497 = vmatpush3.bf16.msra.mxu0 %v496_v14  ;;  %v216_v29 = vadd.f32 %v215_v24, %v209_v26 }
  0xf4   :  { %498 = vmatprep.subr.bf16.mxu0 %v800_v0 }
  0xf5   :  { %v217_v34 = vadd.f32 %v216_v29, %v210_v31 }
  0xf7   :  { %500 = vmatpush3.bf16.msra.mxu0 %v499_v20  ;;  %v218_v39 = vadd.f32 %v217_v34, %v211_v36 }
  0xf8   :  { %501 = vmatprep.subr.bf16.mxu0 %v800_v0 }
  0xf9   :  { %v220_v41 = vmul.f32 0.125, %v218_v39 }
  0xfb   :  { %503 = vmatpush3.bf16.msra.mxu0 %v502_v25 }
  0xfc   :  { %504 = vmatprep.subr.bf16.mxu0 %v800_v0 }
  0xff   :  { %506 = vmatpush3.bf16.msra.mxu0 %v505_v30 }
 0x100   :  { %507 = vmatprep.subr.bf16.mxu0 %v800_v0 }
 0x103   :  { %509 = vmatpush3.bf16.msra.mxu0 %v508_v35 }
 0x104   :  { %510 = vmatprep.subr.bf16.mxu0 %v800_v0 }
 0x107   :  { %512 = vmatpush3.bf16.msra.mxu0 %v511_v40 }
 0x10a   :  { %487 = vmatmul.mubr.f32.vlgmr.msra.gmra.mrb[0].mxu0 %v220_v41 }
 0x1dd   :  { %v310_v43 = vpop.f32.mrb[0].mxu0 }
 0x1de   :  { %v311_v44 = vadd.f32 %v420_v42, %v310_v43  ;;  %v488_v45 = vpop.f32.mrb[1].mxu0 }
 0x1e0   :  { %314 = vmax.xlane.f32.xlu0 %v311_v44 }
 0x26d   :  { %v315_v46 = vpop.xlane.xlu0 %314 }
 0x26e   :  { %v316_v47 = vsub.f32 %v311_v44, %v315_v46 }
 0x270   :  { %v317_v48 = vmul.f32 1.442695, %v316_v47 }
 0x272   :  { %529 = vpow2.f32 %v317_v48 }
 0x27c   :  { %v530_v49 = vpop.eup %529 }
 0x27d   :  { %319 = vadd.xlane.f32.xlu0 %v530_v49 }
 0x30a   :  { %v320_v50 = vpop.xlane.xlu0 %319 }
 0x30b   :  { %531 = vrcp.f32 %v320_v50 }
 0x315   :  { %v532_v51 = vpop.eup %531 }
 0x316   :  { %v322_v52 = vmul.f32 %v532_v51, %v530_v49 }
 0x318   :  { %323 = vst [vmem:[#allocation9] sm:$0xff] %v322_v52 }
 0x319   :  { %768 = shalt.err (!%p765_p0)
}
 0x31a   :  { %s769_s14 = scalar_lea.hbm %s1036_s4, 128 }
 0x31b   :  { %p770_p1 = scmp.ne.s32.totalorder %s1036_s4, %s769_s14  ;;  %p773_p2 = scmp.lt.u32.totalorder %s769_s14, %s1036_s4 }
 0x31d   :  { %p775_p3 = pnand %p773_p2, %p770_p1 }
 0x31f   :  { %778 = shalt.err (!%p775_p3)
}
 0x320   :  { %333 = dma.vmem_to_hbm [thread:$0]  %s331_s9, 128, %s1036_s4, [#allocation6]  }
 0x321   :  { %789 = dma.done.wait [#allocation6], 128  }
 0x322   :  { %790 = vsyncadd [#allocation6], 4294967168 }
 0x323   :  { %337 = vsyncpa [#allocation5], 1 }
 0x324   :  { %338 = vsyncpa [#allocation6], 1 }
 0x325   :  { %339 = vsyncpa [#allocation7], 1 }
 0x326   :  { %340 = vsyncmov [#allocation3] }
 0x329   :  { %s341_s26 = vpop.sfrf %340 }
 0x32a   :  { %p421_p4 = scmp.ne.s32.totalorder %s341_s26, 0 }
 0x32c   :  { %345 = shalt.err (%p421_p4)  }
 0x32d   :  { %347 = vsyncmov [#allocation3 + $0x1] }
 0x330   :  { %s348_s28 = vpop.sfrf %347 }
 0x331   :  { %p422_p5 = scmp.ne.s32.totalorder %s348_s28, 0 }
 0x333   :  { %352 = shalt.err (%p422_p5)  }

</bundles_post_ra>
